<compile_context>
chip_gen: v6e
topology: v6e:2x2x1
jax: 0.10.0
libtpu: 0.0.40
codegen_flags: <defaults>
</compile_context>

<pallas_src>
import math

import jax
import jax.numpy as jnp
from jax import lax
from jax.experimental import pallas as pl
from jax.experimental.pallas import tpu as pltpu

_TM_CAP = 256   # max rows (tokens) per tile
_TK_CAP = 512   # max mlp_dim chunk per grid step
_SQRT1_2 = 0.7071067811865476


def _erf_approx(x):
    """erf via Abramowitz & Stegun 7.1.26 (|err| <= 1.5e-7).

    VPU arithmetic + one EUP exp; matches torch's exact (erf) GELU to well
    below the f32 round-off of the surrounding matmuls, and lowers cleanly
    in Mosaic.
    """
    p = 0.3275911
    a1, a2, a3, a4, a5 = (0.254829592, -0.284496736, 1.421413741,
                          -1.453152027, 1.061405429)
    ax = jnp.abs(x)
    t = 1.0 / (1.0 + p * ax)
    poly = t * (a1 + t * (a2 + t * (a3 + t * (a4 + t * a5))))
    e = 1.0 - poly * jnp.exp(-(ax * ax))
    return jnp.where(x < 0.0, -e, e)


def _gelu_exact(x):
    return 0.5 * x * (1.0 + _erf_approx(x * _SQRT1_2))


def mlp_kernel(x_ref, w1_ref, b1_ref, w2_ref, b2_ref, o_ref):
    """Fused fc1 + GELU + fc2 over one mlp_dim chunk (grid axis 1)."""
    k = pl.program_id(1)

    @pl.when(k == 0)
    def _init():
        # Seed the resident f32 output block with the fc2 bias; fc2 partial
        # sums accumulate on top of it across the mlp_dim reduction axis.
        o_ref[...] = jnp.broadcast_to(b2_ref[...], o_ref.shape)

    # fc1 chunk on the MXU: (tm, H) @ (H, tk) -> (tm, tk), f32 accumulation.
    h = jnp.dot(x_ref[...], w1_ref[...], preferred_element_type=jnp.float32)
    h = _gelu_exact(h + b1_ref[...])
    # TODO(synk): nn.Dropout is identity here (eval / dropout_rate=0 path);
    # training-mode dropout would use pltpu.prng_seed + stateful_bernoulli.

    # fc2 partial sum for this mlp_dim chunk: (tm, tk) @ (tk, H) -> (tm, H).
    o_ref[...] += jnp.dot(h, w2_ref[...], preferred_element_type=jnp.float32)


def _round_up(x, m):
    return (x + m - 1) // m * m


def _pick_tile(dim, cap, unit):
    """Largest tile <= cap that is a multiple of `unit` and divides `dim`,
    or the full dim if none exists / dim already fits."""
    if dim <= cap:
        return dim
    t = (cap // unit) * unit
    while t >= unit:
        if dim % t == 0:
            return t
        t -= unit
    return dim


@jax.jit
def mlp_forward(x, w1, b1, w2, b2):
    """x: (..., hidden); w1: (mlp_dim, hidden); b1: (mlp_dim,);
    w2: (hidden, mlp_dim); b2: (hidden,)  — torch Linear layouts."""
    hidden = w1.shape[1]
    mlp_dim = w1.shape[0]
    orig_shape = x.shape

    x2d = x.reshape(-1, hidden).astype(jnp.float32)
    m = x2d.shape[0]
    mp = _round_up(m, 8)
    if mp != m:
        x2d = jnp.pad(x2d, ((0, mp - m), (0, 0)))

    tm = _pick_tile(mp, _TM_CAP, 8)
    tk = _pick_tile(mlp_dim, _TK_CAP, 128)
    n_m = mp // tm
    n_k = mlp_dim // tk

    w1t = jnp.transpose(w1).astype(jnp.float32)        # (hidden, mlp_dim)
    w2t = jnp.transpose(w2).astype(jnp.float32)        # (mlp_dim, hidden)
    b1r = b1.reshape(1, mlp_dim).astype(jnp.float32)
    b2r = b2.reshape(1, hidden).astype(jnp.float32)

    out2d = pl.pallas_call(
        mlp_kernel,
        out_shape=jax.ShapeDtypeStruct((mp, hidden), jnp.float32),
        grid_spec=pltpu.PrefetchScalarGridSpec(
            num_scalar_prefetch=0,
            grid=(n_m, n_k),
            in_specs=[
                pl.BlockSpec((tm, hidden), lambda i, k: (i, 0)),   # x rows
                pl.BlockSpec((hidden, tk), lambda i, k: (0, k)),   # W1 chunk
                pl.BlockSpec((1, tk), lambda i, k: (0, k)),        # b1 chunk
                pl.BlockSpec((tk, hidden), lambda i, k: (k, 0)),   # W2 chunk
                pl.BlockSpec((1, hidden), lambda i, k: (0, 0)),    # b2
            ],
            out_specs=pl.BlockSpec((tm, hidden), lambda i, k: (i, 0)),
        ),
        compiler_params=pltpu.CompilerParams(
            dimension_semantics=("parallel", "arbitrary"),
            vmem_limit_bytes=32 * 1024 * 1024,
        ),
    )(x2d, w1t, b1r, w2t, b2r)

    if mp != m:
        out2d = out2d[:m]
    return out2d.reshape(orig_shape)


# ---------------------------------------------------------------------------
# Pure-JAX reference (exact erf GELU, highest-precision matmuls).
# ---------------------------------------------------------------------------
def _ref_forward(x, w1, b1, w2, b2):
    h = jnp.einsum("...i,oi->...o", x, w1,
                   precision=lax.Precision.HIGHEST) + b1
    h = jax.nn.gelu(h, approximate=False)
    out = jnp.einsum("...i,oi->...o", h, w2,
                     precision=lax.Precision.HIGHEST) + b2
    return out


if __name__ == "__main__":
    key = jax.random.PRNGKey(0)
    kx, kw1, kb1, kw2, kb2 = jax.random.split(key, 5)

    # Small shapes consistent with the module: tokens x hidden, 4x MLP.
    B, S, HIDDEN, MLP_DIM = 2, 8, 32, 128
    x = jax.random.normal(kx, (B, S, HIDDEN), jnp.float32)

    # Xavier-uniform weights, tiny-normal biases (matches _init_weights).
    lim = math.sqrt(6.0 / (HIDDEN + MLP_DIM))
    w1 = jax.random.uniform(kw1, (MLP_DIM, HIDDEN), jnp.float32, -lim, lim)
    b1 = jax.random.normal(kb1, (MLP_DIM,), jnp.float32) * 1e-6
    w2 = jax.random.uniform(kw2, (HIDDEN, MLP_DIM), jnp.float32, -lim, lim)
    b2 = jax.random.normal(kb2, (HIDDEN,), jnp.float32) * 1e-6

    out = mlp_forward(x, w1, b1, w2, b2)
    jax.block_until_ready(out)

    ref = _ref_forward(x, w1, b1, w2, b2)
    err = float(jnp.max(jnp.abs(out - ref)))
    # All-f32 MXU path + erf poly (|err|<=1.5e-7): expected ~1e-5.
    if err > 5e-4:
        raise AssertionError(f"Pallas output mismatch vs reference: max|diff|={err}")

    print("KERNEL_OK")
</pallas_src>

<mosaic_0001>
module attributes {stable_mosaic.version = 11 : i64} {
  func.func @mlp_kernel(%arg0: i32, %arg1: i32, %arg2: memref<16x32xf32, #tpu.memory_space<vmem>>, %arg3: memref<32x128xf32, #tpu.memory_space<vmem>>, %arg4: memref<1x128xf32, #tpu.memory_space<vmem>>, %arg5: memref<128x32xf32, #tpu.memory_space<vmem>>, %arg6: memref<1x32xf32, #tpu.memory_space<vmem>>, %arg7: memref<16x32xf32, #tpu.memory_space<vmem>>) attributes {dimension_semantics = [#tpu.dimension_semantics<parallel>, #tpu.dimension_semantics<arbitrary>], iteration_bounds = array<i64: 1, 1>, scalar_prefetch = 0 : i64, scratch_operands = 0 : i64, tpu.core_type = #tpu.core_type<tc>, window_params = [{transform_indices = @transform_0, window_bounds = array<i64: 16, 32>}, {transform_indices = @transform_1, window_bounds = array<i64: 32, 128>}, {transform_indices = @transform_2, window_bounds = array<i64: 1, 128>}, {transform_indices = @transform_3, window_bounds = array<i64: 128, 32>}, {pipeline_mode = #tpu.pipeline_mode<synchronous>, transform_indices = @transform_4, window_bounds = array<i64: 1, 32>}, {transform_indices = @transform_5, window_bounds = array<i64: 16, 32>}]} {
    %c0_i32 = arith.constant 0 : i32
    %0 = arith.cmpi eq, %arg1, %c0_i32 : i32
    %1 = arith.extui %0 : i1 to i32
    %c0_i32_0 = arith.constant 0 : i32
    %2 = arith.cmpi ne, %1, %c0_i32_0 : i32
    scf.if %2 {
      %c0_28 = arith.constant 0 : index
      %c0_29 = arith.constant 0 : index
      %54 = vector.load %arg6[%c0_28, %c0_29] : memref<1x32xf32, #tpu.memory_space<vmem>>, vector<1x32xf32>
      %55 = vector.shape_cast %54 : vector<1x32xf32> to vector<1x32xf32>
      %56 = vector.broadcast %55 : vector<1x32xf32> to vector<16x32xf32>
      %c0_30 = arith.constant 0 : index
      %c0_31 = arith.constant 0 : index
      %57 = vector.load %arg7[%c0_30, %c0_31] : memref<16x32xf32, #tpu.memory_space<vmem>>, vector<16x32xf32>
      tpu.vector_store %arg7[%c0_30, %c0_31], %56 {strides = array<i32>} : memref<16x32xf32, #tpu.memory_space<vmem>>, vector<16x32xf32>,
    } else {
    }
    %c0 = arith.constant 0 : index
    %c0_1 = arith.constant 0 : index
    %3 = vector.load %arg2[%c0, %c0_1] : memref<16x32xf32, #tpu.memory_space<vmem>>, vector<16x32xf32>
    %c0_2 = arith.constant 0 : index
    %c0_3 = arith.constant 0 : index
    %4 = vector.load %arg3[%c0_2, %c0_3] : memref<32x128xf32, #tpu.memory_space<vmem>>, vector<32x128xf32>
    %cst = arith.constant dense<0.000000e+00> : vector<16x128xf32>
    %5 = tpu.matmul %3, %4, %cst {dimension_numbers = #tpu.dot_dimension_numbers<[1], [0], [0], [1], [0, 0, 1, 1], [], []>} : vector<16x32xf32>, vector<32x128xf32>, vector<16x128xf32> -> vector<16x128xf32>
    %c0_4 = arith.constant 0 : index
    %c0_5 = arith.constant 0 : index
    %6 = vector.load %arg4[%c0_4, %c0_5] : memref<1x128xf32, #tpu.memory_space<vmem>>, vector<1x128xf32>
    %7 = vector.broadcast %6 : vector<1x128xf32> to vector<16x128xf32>
    %8 = arith.addf %5, %7 : vector<16x128xf32>
    %cst_6 = arith.constant 5.000000e-01 : f32
    %9 = vector.broadcast %cst_6 : f32 to vector<16x128xf32>
    %10 = arith.mulf %9, %8 : vector<16x128xf32>
    %cst_7 = arith.constant 0.707106769 : f32
    %11 = vector.broadcast %cst_7 : f32 to vector<16x128xf32>
    %12 = arith.mulf %8, %11 : vector<16x128xf32>
    %13 = math.absf %12 : vector<16x128xf32>
    %cst_8 = arith.constant 0.327591091 : f32
    %14 = vector.broadcast %cst_8 : f32 to vector<16x128xf32>
    %15 = arith.mulf %14, %13 : vector<16x128xf32>
    %cst_9 = arith.constant 1.000000e+00 : f32
    %16 = vector.broadcast %cst_9 : f32 to vector<16x128xf32>
    %17 = arith.addf %16, %15 : vector<16x128xf32>
    %cst_10 = arith.constant 1.000000e+00 : f32
    %18 = vector.broadcast %cst_10 : f32 to vector<16x128xf32>
    %19 = arith.divf %18, %17 : vector<16x128xf32>
    %cst_11 = arith.constant 1.06140542 : f32
    %20 = vector.broadcast %cst_11 : f32 to vector<16x128xf32>
    %21 = arith.mulf %19, %20 : vector<16x128xf32>
    %cst_12 = arith.constant -1.45315206 : f32
    %22 = vector.broadcast %cst_12 : f32 to vector<16x128xf32>
    %23 = arith.addf %22, %21 : vector<16x128xf32>
    %24 = arith.mulf %19, %23 : vector<16x128xf32>
    %cst_13 = arith.constant 1.42141378 : f32
    %25 = vector.broadcast %cst_13 : f32 to vector<16x128xf32>
    %26 = arith.addf %25, %24 : vector<16x128xf32>
    %27 = arith.mulf %19, %26 : vector<16x128xf32>
    %cst_14 = arith.constant -0.284496725 : f32
    %28 = vector.broadcast %cst_14 : f32 to vector<16x128xf32>
    %29 = arith.addf %28, %27 : vector<16x128xf32>
    %30 = arith.mulf %19, %29 : vector<16x128xf32>
    %cst_15 = arith.constant 0.254829586 : f32
    %31 = vector.broadcast %cst_15 : f32 to vector<16x128xf32>
    %32 = arith.addf %31, %30 : vector<16x128xf32>
    %33 = arith.mulf %19, %32 : vector<16x128xf32>
    %34 = arith.mulf %13, %13 : vector<16x128xf32>
    %cst_16 = arith.constant 0.000000e+00 : f32
    %35 = vector.broadcast %cst_16 : f32 to vector<16x128xf32>
    %36 = arith.subf %35, %34 : vector<16x128xf32>
    %37 = math.exp %36 : vector<16x128xf32>
    %38 = arith.mulf %33, %37 : vector<16x128xf32>
    %cst_17 = arith.constant 1.000000e+00 : f32
    %39 = vector.broadcast %cst_17 : f32 to vector<16x128xf32>
    %40 = arith.subf %39, %38 : vector<16x128xf32>
    %cst_18 = arith.constant 0.000000e+00 : f32
    %41 = vector.broadcast %cst_18 : f32 to vector<16x128xf32>
    %42 = arith.cmpf olt, %12, %41 : vector<16x128xf32>
    %cst_19 = arith.constant 0.000000e+00 : f32
    %43 = vector.broadcast %cst_19 : f32 to vector<16x128xf32>
    %44 = arith.subf %43, %40 : vector<16x128xf32>
    %45 = arith.select %42, %44, %40 : vector<16x128xi1>, vector<16x128xf32>
    %cst_20 = arith.constant 1.000000e+00 : f32
    %46 = vector.broadcast %cst_20 : f32 to vector<16x128xf32>
    %47 = arith.addf %46, %45 : vector<16x128xf32>
    %48 = arith.mulf %10, %47 : vector<16x128xf32>
    %c0_21 = arith.constant 0 : index
    %c0_22 = arith.constant 0 : index
    %49 = vector.load %arg7[%c0_21, %c0_22] : memref<16x32xf32, #tpu.memory_space<vmem>>, vector<16x32xf32>
    %c0_23 = arith.constant 0 : index
    %c0_24 = arith.constant 0 : index
    %50 = vector.load %arg5[%c0_23, %c0_24] : memref<128x32xf32, #tpu.memory_space<vmem>>, vector<128x32xf32>
    %cst_25 = arith.constant dense<0.000000e+00> : vector<16x32xf32>
    %51 = tpu.matmul %48, %50, %cst_25 {dimension_numbers = #tpu.dot_dimension_numbers<[1], [0], [0], [1], [0, 0, 1, 1], [], []>} : vector<16x128xf32>, vector<128x32xf32>, vector<16x32xf32> -> vector<16x32xf32>
    %52 = arith.addf %49, %51 : vector<16x32xf32>
    %c0_26 = arith.constant 0 : index
    %c0_27 = arith.constant 0 : index
    %53 = vector.load %arg7[%c0_26, %c0_27] : memref<16x32xf32, #tpu.memory_space<vmem>>, vector<16x32xf32>
    tpu.vector_store %arg7[%c0_26, %c0_27], %52 {strides = array<i32>} : memref<16x32xf32, #tpu.memory_space<vmem>>, vector<16x32xf32>,
    return
  }
  func.func @transform_0(%arg0: i32, %arg1: i32) -> (i32, i32) {
    %c0_i32 = arith.constant 0 : i32
    %c0_i32_0 = arith.constant 0 : i32
    return %arg0, %c0_i32 : i32, i32
  }
  func.func @transform_1(%arg0: i32, %arg1: i32) -> (i32, i32) {
    %c0_i32 = arith.constant 0 : i32
    %c0_i32_0 = arith.constant 0 : i32
    return %c0_i32, %arg1 : i32, i32
  }
  func.func @transform_2(%arg0: i32, %arg1: i32) -> (i32, i32) {
    %c0_i32 = arith.constant 0 : i32
    %c0_i32_0 = arith.constant 0 : i32
    return %c0_i32, %arg1 : i32, i32
  }
  func.func @transform_3(%arg0: i32, %arg1: i32) -> (i32, i32) {
    %c0_i32 = arith.constant 0 : i32
    %c0_i32_0 = arith.constant 0 : i32
    return %arg1, %c0_i32 : i32, i32
  }
  func.func @transform_4(%arg0: i32, %arg1: i32) -> (i32, i32) {
    %c0_i32 = arith.constant 0 : i32
    %c0_i32_0 = arith.constant 0 : i32
    %c0_i32_1 = arith.constant 0 : i32
    return %c0_i32, %c0_i32_0 : i32, i32
  }
  func.func @transform_5(%arg0: i32, %arg1: i32) -> (i32, i32) {
    %c0_i32 = arith.constant 0 : i32
    %c0_i32_0 = arith.constant 0 : i32
    return %arg0, %c0_i32 : i32, i32
  }
}

</mosaic_0001>

<bundles_post_ra>
// kernel: mlp_forward.1
= control target key start
LH: loop header
LB: loop body
LE: loop exit
PB: predicated region body
PF: predicated region fallthrough
CT: control target
= control target key end

     0   :  { %vm32_vm0 = vcmask 261120   ;;  %s518_s0 = inlined_call_operand.vmem [shape: f32[16,32], index: 0, kind: input, shape index: {}]   ;;  %s519_s1 = inlined_call_operand.vmem [shape: f32[32,128], index: 1, kind: input, shape index: {}]   ;;  %s520_s2 = inlined_call_operand.vmem [shape: f32[1,128], index: 2, kind: input, shape index: {}]   ;;  %s521_s3 = inlined_call_operand.vmem [shape: f32[128,32], index: 3, kind: input, shape index: {}]   ;;  %s522_s4 = inlined_call_operand.vmem [shape: f32[1,32], index: 4, kind: input, shape index: {}]   ;;  %s523_s5 = inlined_call_operand.hbm [shape: f32[16,32], index: 5, kind: output, shape index: {}]  }
   0x1   :  { %v40_v0 = vld [vmem:[%s519_s1 + $0x18] sm:$0xff]  ;;  %v39_v1 = vld [vmem:[%s519_s1 + $0x10] sm:$0xff]  ;;  %v35_v2 = vld [vmem:[%s518_s0] sm:$0xff] }
   0x2   :  { %325 = vmatprep.subr.mxu0 %v40_v0  ;;  %v38_v3 = vld [vmem:[%s519_s1 + $0x8] sm:$0xff]  ;;  %333 = vmatprep.mubr.msk.f32.mxu0 %vm32_vm0, %v35_v2 }
   0x3   :  { %326 = vmatpush3.msra.mxu0 %v40_v0 }
   0x4   :  { %10 = vsyncpa [#allocation3], 0  ;;  %327 = vmatprep.subr.mxu0 %v39_v1  ;;  %v37_v4 = vld [vmem:[%s519_s1] sm:$0xff]  ;;  %v36_v5 = vld [vmem:[%s518_s0 + $0x8] sm:$0xff] }
   0x5   :  { %328 = vmatpush3.msra.mxu0 %v39_v1  ;;  %v201_v6 = vld [vmem:[%s521_s3 + $0x78] sm:$0xff]  ;;  %v200_v7 = vld [vmem:[%s521_s3 + $0x70] sm:$0xff]  ;;  %v199_v8 = vld [vmem:[%s521_s3 + $0x68] sm:$0xff] }
   0x6   :  { %329 = vmatprep.subr.mxu0 %v38_v3  ;;  %336 = vmatprep.subr.mxu1 %v201_v6  ;;  %v198_v9 = vld [vmem:[%s521_s3 + $0x60] sm:$0xff]  ;;  %v197_v10 = vld [vmem:[%s521_s3 + $0x58] sm:$0xff]  ;;  %v196_v11 = vld [vmem:[%s521_s3 + $0x50] sm:$0xff] }
   0x7   :  { %330 = vmatpush3.msra.mxu0 %v38_v3  ;;  %337 = vmatpush3.msra.mxu1 %v201_v6  ;;  %v195_v12 = vld [vmem:[%s521_s3 + $0x48] sm:$0xff]  ;;  %v194_v13 = vld [vmem:[%s521_s3 + $0x40] sm:$0xff]  ;;  %v193_v14 = vld [vmem:[%s521_s3 + $0x38] sm:$0xff] }
   0x8   :  { %331 = vmatprep.subr.mxu0 %v37_v4  ;;  %338 = vmatprep.subr.mxu1 %v200_v7  ;;  %v192_v15 = vld [vmem:[%s521_s3 + $0x30] sm:$0xff]  ;;  %v191_v16 = vld [vmem:[%s521_s3 + $0x28] sm:$0xff]  ;;  %v190_v17 = vld [vmem:[%s521_s3 + $0x20] sm:$0xff] }
   0x9   :  { %332 = vmatpush3.msra.mxu0 %v37_v4  ;;  %339 = vmatpush3.msra.mxu1 %v200_v7  ;;  %v189_v18 = vld [vmem:[%s521_s3 + $0x18] sm:$0xff]  ;;  %v188_v19 = vld [vmem:[%s521_s3 + $0x10] sm:$0xff]  ;;  %v187_v20 = vld [vmem:[%s521_s3 + $0x8] sm:$0xff] }
   0xa   :  { %334 = vmatmul.mubr.msk.f32.vlgmr.msra.gmra.mxu0 %vm32_vm0, %v36_v5  ;;  %340 = vmatprep.subr.mxu1 %v199_v8  ;;  %v186_v21 = vld [vmem:[%s521_s3] sm:$0xff] }
   0xb   :  { %341 = vmatpush3.msra.mxu1 %v199_v8  ;;  %v297_v22 = vld [vmem:[%s522_s4] ss:$0 sm:$0xff] }
   0xc   :  { %342 = vmatprep.subr.mxu1 %v198_v9  ;;  %34 = vst.msk [vmem:[#allocation2 + $0x8] sm:$0xff] %vm32_vm0, %v297_v22  ;;  %33 = vst.msk [vmem:[#allocation2] sm:$0xff] %vm32_vm0, %v297_v22  ;;  %v298_v23 = vld [vmem:[%s520_s2] ss:$0 sm:$0xff]  ;;  %s404_s2 = smov [#allocation2]  }
   0xd   :  { %343 = vmatpush3.msra.mxu1 %v198_v9  ;;  %s286_s3 = sshll.u32 %s404_s2, 4  ;;  %s287_s3 = int_to_ptr.vmem [resolvable:$true] %s286_s3 }
   0xe   :  { %344 = vmatprep.subr.mxu1 %v197_v10  ;;  %s382_s4 = scalar_lea.vmem %s287_s3, 256  ;;  %p387_p1 = scmp.lt.s32.totalorder %s287_s3, %s287_s3 }
   0xf   :  { %345 = vmatpush3.msra.mxu1 %v197_v10  ;;  %p383_p0 = scmp.ne.s32.totalorder %s287_s3, %s382_s4  ;;  %p388_p2 = scmp.lt.s32.totalorder %s382_s4, %s382_s4 }
  0x10   :  { %346 = vmatprep.subr.mxu1 %v196_v11 }
  0x11   :  { %347 = vmatpush3.msra.mxu1 %v196_v11  ;;  %p389_p3 = por %p388_p2, %p387_p1 }
  0x12   :  { %348 = vmatprep.subr.mxu1 %v195_v12 }
  0x13   :  { %349 = vmatpush3.msra.mxu1 %v195_v12  ;;  %p390_p4 = pnand %p389_p3, %p383_p0 }
  0x14   :  { %350 = vmatprep.subr.mxu1 %v194_v13 }
  0x15   :  { %351 = vmatpush3.msra.mxu1 %v194_v13 }
  0x16   :  { %352 = vmatprep.subr.mxu1 %v193_v14 }
  0x17   :  { %353 = vmatpush3.msra.mxu1 %v193_v14  ;;  %v185_v14 = vld [vmem:[#allocation2 + $0x8] sm:$0xff] }
  0x18   :  { %354 = vmatprep.subr.mxu1 %v192_v15 }
  0x19   :  { %355 = vmatpush3.msra.mxu1 %v192_v15 }
  0x1a   :  { %356 = vmatprep.subr.mxu1 %v191_v16 }
  0x1b   :  { %357 = vmatpush3.msra.mxu1 %v191_v16  ;;  %v184_v16 = vld [vmem:[#allocation2] sm:$0xff] }
  0x1c   :  { %358 = vmatprep.subr.mxu1 %v190_v17 }
  0x1d   :  { %359 = vmatpush3.msra.mxu1 %v190_v17 }
  0x1e   :  { %360 = vmatprep.subr.mxu1 %v189_v18 }
  0x1f   :  { %361 = vmatpush3.msra.mxu1 %v189_v18 }
  0x20   :  { %362 = vmatprep.subr.mxu1 %v188_v19 }
  0x21   :  { %363 = vmatpush3.msra.mxu1 %v188_v19 }
  0x22   :  { %364 = vmatprep.subr.mxu1 %v187_v20 }
  0x23   :  { %365 = vmatpush3.msra.mxu1 %v187_v20 }
  0x24   :  { %366 = vmatprep.subr.mxu1 %v186_v21 }
  0x25   :  { %367 = vmatpush3.msra.mxu1 %v186_v21 }
  0xca   :  { %v335_v24 = vpop.f32.mrf.mxu0 }
  0xcb   :  { %v127_v25 = vadd.f32 %v335_v24, %v298_v23 }
  0xcc   :  { %v121_v26 = vpop.f32.mrf.mxu0 }
  0xcd   :  { %v133_v27 = vmul.f32 0.70710677, %v127_v25  ;;  %v122_v28 = vadd.f32 %v298_v23, %v121_v26  ;;  %v131_v11 = vmul.f32 0.5, %v127_v25 }
  0xcf   :  { %v135_v29 = vand.u32 2147483647, %v133_v27  ;;  %v132_v30 = vmul.f32 0.70710677, %v122_v28  ;;  %vm175_vm1 = vcmp.lt.f32.partialorder %v133_v27, 0.0  ;;  %v130_v9 = vmul.f32 0.5, %v122_v28 }
  0xd1   :  { %v137_v31 = vmul.f32 0.3275911, %v135_v29  ;;  %v134_v32 = vand.u32 2147483647, %v132_v30  ;;  %v163_v36 = vmul.f32 %v135_v29, %v135_v29  ;;  %vm174_vm2 = vcmp.lt.f32.partialorder %v132_v30, 0.0 }
  0xd3   :  { %v139_v33 = vadd.f32 1.0, %v137_v31  ;;  %v136_v34 = vmul.f32 0.3275911, %v134_v32  ;;  %v162_v37 = vmul.f32 %v134_v32, %v134_v32  ;;  %v165_v38 = vsub.f32 0.0, %v163_v36 }
  0xd5   :  { %374 = vrcp.f32 %v139_v33  ;;  %v138_v35 = vadd.f32 1.0, %v136_v34  ;;  %v164_v40 = vsub.f32 0.0, %v162_v37  ;;  %v168_v41 = vmul.f32 1.442695, %v165_v38 }
  0xd7   :  { %376 = vrcp.f32 %v138_v35  ;;  %v166_v45 = vmul.f32 1.442695, %v164_v40 }
  0xd8   :  { %378 = vpow2.f32 %v168_v41 }
  0xd9   :  { %380 = vpow2.f32 %v166_v45 }
  0xe2   :  { %v375_v39 = vpop.eup %374 }
  0xe3   :  { %v145_v42 = vmul.f32 1.0614054, %v375_v39 }
  0xe4   :  { %v377_v43 = vpop.eup %376 }
  0xe5   :  { %v147_v44 = vadd.f32 -1.4531521, %v145_v42  ;;  %v144_v46 = vmul.f32 1.0614054, %v377_v43  ;;  %v379_v60 = vpop.eup %378 }
  0xe6   :  { %v381_v0 = vpop.eup %380 }
  0xe7   :  { %v149_v47 = vmul.f32 %v375_v39, %v147_v44  ;;  %v146_v48 = vadd.f32 -1.4531521, %v144_v46 }
  0xe9   :  { %v151_v49 = vadd.f32 1.4214138, %v149_v47  ;;  %v148_v50 = vmul.f32 %v377_v43, %v146_v48 }
  0xeb   :  { %v153_v51 = vmul.f32 %v375_v39, %v151_v49  ;;  %v150_v52 = vadd.f32 1.4214138, %v148_v50 }
  0xed   :  { %v155_v53 = vadd.f32 -0.28449672, %v153_v51  ;;  %v152_v54 = vmul.f32 %v377_v43, %v150_v52 }
  0xef   :  { %v157_v55 = vmul.f32 %v375_v39, %v155_v53  ;;  %v154_v56 = vadd.f32 -0.28449672, %v152_v54 }
  0xf1   :  { %v159_v57 = vadd.f32 0.2548296, %v157_v55  ;;  %v156_v58 = vmul.f32 %v377_v43, %v154_v56 }
  0xf3   :  { %v161_v59 = vmul.f32 %v375_v39, %v159_v57  ;;  %v158_v61 = vadd.f32 0.2548296, %v156_v58 }
  0xf5   :  { %v171_v62 = vmul.f32 %v379_v60, %v161_v59  ;;  %v160_v63 = vmul.f32 %v377_v43, %v158_v61 }
  0xf7   :  { %v173_v1 = vsub.f32 1.0, %v171_v62  ;;  %v170_v2 = vmul.f32 %v381_v0, %v160_v63 }
  0xf9   :  { %v177_v3 = vsub.f32 0.0, %v173_v1  ;;  %v172_v4 = vsub.f32 1.0, %v170_v2 }
  0xfb   :  { %v179_v5 = vsel %vm175_vm1, %v177_v3, %v173_v1  ;;  %v176_v6 = vsub.f32 0.0, %v172_v4 }
  0xfc   :  { %v181_v8 = vadd.f32 1.0, %v179_v5 }
  0xfd   :  { %v178_v7 = vsel %vm174_vm2, %v176_v6, %v172_v4 }
  0xfe   :  { %v180_v10 = vadd.f32 1.0, %v178_v7  ;;  %v183_v13 = vmul.f32 %v181_v8, %v131_v11 }
 0x100   :  { %v182_v12 = vmul.f32 %v180_v10, %v130_v9 }
 0x102   :  { %368 = vmatprep.mubr.f32.mxu1 %v182_v12 }
 0x103   :  { %369 = vmatmul.mubr.f32.vlgmr.msra.gmra.mxu1 %v183_v13 }
 0x1c3   :  { %v370_v15 = vpop.f32.mrf.mxu1 }
 0x1c4   :  { %v278_v17 = vadd.f32 %v370_v15, %v185_v14 }
 0x1c5   :  { %v268_v18 = vpop.f32.mrf.mxu1 }
 0x1c6   :  { %280 = vst.msk [vmem:[#allocation2 + $0x8] sm:$0xff] %vm32_vm0, %v278_v17  ;;  %v277_v19 = vadd.f32 %v268_v18, %v184_v16 }
 0x1c8   :  { %279 = vst.msk [vmem:[#allocation2] sm:$0xff] %vm32_vm0, %v277_v19 }
 0x1c9   :  { %393 = shalt.err (!%p390_p4)
}
 0x1ca   :  { %s405_s12 = smov 128   ;;  %s406_s13 = smov 8  }
 0x1cb   :  { %292 = dma.vmem_to_hbm [thread:$0]  %s287_s3, 256, %s523_s5, [#allocation3], %s405_s12, %s405_s12, %s406_s13  }
 0x1cc   :  { %402 = dma.done.wait [#allocation3], 256  }
 0x1cd   :  { %403 = vsyncadd [#allocation3], 4294967040 }
 0x1ce   :  { %296 = vsyncpa [#allocation3], 1 }

</bundles_post_ra>
